<compile_context>
chip_gen: v7x
topology: tpu7x:2x2x1
jax: 0.10.0
libtpu: 0.0.40
codegen_flags: <defaults>
</compile_context>

<pallas_src>
import functools
import math

import jax
import jax.numpy as jnp
from jax.experimental import pallas as pl
from jax.experimental.pallas import tpu as pltpu


def _layernorm_kernel(x_ref, g_ref, b_ref, o_ref, *, eps, feat):
    """Plain path. x_ref: (TR, feat); g_ref/b_ref: (1, feat)."""
    x = x_ref[...].astype(jnp.float32)
    mean = jnp.sum(x, axis=-1, keepdims=True) * (1.0 / feat)
    c = x - mean
    var = jnp.sum(c * c, axis=-1, keepdims=True) * (1.0 / (feat - 1))  # unbiased
    std = jnp.sqrt(var)
    inv = 1.0 / (std + eps)                         # exact divide; eps on std
    gamma = g_ref[...].astype(jnp.float32)
    beta = b_ref[...].astype(jnp.float32)
    o_ref[...] = (c * inv * gamma + beta).astype(o_ref.dtype)


def _layernorm_grouped_kernel(x_ref, g_ref, b_ref, seg_ref, o_ref, *, eps, feat):
    """Lane-dense path: `groups` original rows packed along the 128-lane axis.

    x_ref: (TR, groups*feat); seg_ref: (groups*feat, groups*feat) block-diagonal
    0/1 matrix (constant input, DMA'd once) used on the otherwise-idle MXU to
    compute per-group sums broadcast back to every lane of the group.
    """
    x = x_ref[...].astype(jnp.float32)
    seg = seg_ref[...]
    hp = jax.lax.Precision.HIGHEST                   # keep ~f32 accuracy on MXU
    s = jnp.dot(x, seg, preferred_element_type=jnp.float32, precision=hp)
    mean = s * (1.0 / feat)
    c = x - mean
    ss = jnp.dot(c * c, seg, preferred_element_type=jnp.float32, precision=hp)
    var = jnp.maximum(ss * (1.0 / (feat - 1)), 0.0)  # unbiased; clamp is free
    std = jnp.sqrt(var)
    inv = 1.0 / (std + eps)
    gamma = g_ref[...].astype(jnp.float32)
    beta = b_ref[...].astype(jnp.float32)
    o_ref[...] = (c * inv * gamma + beta).astype(o_ref.dtype)


def _vmem_budget_and_limit():
    """Per-generation VMEM budget (for tile sizing) and scoped-VMEM limit."""
    budget, limit = 8 * 1024 * 1024, 32 * 1024 * 1024   # safe everywhere incl. v7x
    try:
        cap = pltpu.get_tpu_info().vmem_capacity_bytes
        if cap >= 128 * 1024 * 1024:                     # v5e / v6e: 128 MiB VMEM
            budget, limit = 16 * 1024 * 1024, 64 * 1024 * 1024
    except Exception:
        pass                                             # interpret / unknown HW
    return budget, limit


def layernorm_pallas(x, gamma, beta, eps=1e-6):
    """LayerNorm over the last axis. x: (..., H); gamma, beta: (H,)."""
    orig_shape = x.shape
    feat = orig_shape[-1]
    if feat < 2:
        raise ValueError("LayerNorm with unbiased std requires features >= 2")
    rows = math.prod(orig_shape[:-1]) if len(orig_shape) > 1 else 1

    # ---- lane-dense packing for feature dims not a multiple of 128 ----------
    groups = 1
    if feat % 128 != 0:
        g = 128 // math.gcd(feat, 128)       # minimal g with feat*g % 128 == 0
        if g <= 8 and feat * g <= 512 and rows % g == 0:
            groups = g
    lane_w = feat * groups
    rows_k = rows // groups

    x2 = x.reshape(rows_k, lane_w)                       # free row-major view
    g2 = jnp.tile(gamma.reshape(1, feat), (1, groups))   # tiny
    b2 = jnp.tile(beta.reshape(1, feat), (1, groups))

    # ---- row-tile sizing against the per-generation VMEM budget -------------
    vmem_budget, vmem_limit = _vmem_budget_and_limit()
    itemsize = jnp.dtype(x.dtype).itemsize
    sub = {4: 8, 2: 16, 1: 32}.get(itemsize, 8)          # sublane packing
    # double-buffered in+out pipeline buffers (4 * itemsize bytes/elem) plus
    # headroom for the f32 intermediates the compiler materializes (~8 B/elem).
    per_row_bytes = lane_w * (4 * itemsize + 8)
    row_tile = max(sub, vmem_budget // per_row_bytes)
    row_tile = min(row_tile, 4096)                       # no artificial 1024 cap
    if rows_k < row_tile:
        row_tile = rows_k
    row_tile = max(sub, (row_tile // sub) * sub)

    grid = (pl.cdiv(rows_k, row_tile),)                  # partial last tile masked

    cost = pl.CostEstimate(
        flops=10 * rows * feat,
        transcendentals=rows,
        bytes_accessed=2 * rows * feat * itemsize + 2 * feat * itemsize,
    )

    in_specs = [
        pl.BlockSpec((row_tile, lane_w), lambda i: (i, 0)),
        pl.BlockSpec((1, lane_w), lambda i: (0, 0)),
        pl.BlockSpec((1, lane_w), lambda i: (0, 0)),
    ]
    args = [x2, g2, b2]

    if groups > 1:
        # Hoisted block-diagonal reduction matrix (DMA'd once: constant index).
        ids = jnp.arange(lane_w, dtype=jnp.int32) // feat
        seg = (ids[:, None] == ids[None, :]).astype(jnp.float32)
        in_specs.append(pl.BlockSpec((lane_w, lane_w), lambda i: (0, 0)))
        args.append(seg)
        kernel = functools.partial(_layernorm_grouped_kernel,
                                   eps=float(eps), feat=feat)
    else:
        kernel = functools.partial(_layernorm_kernel, eps=float(eps), feat=feat)

    out = pl.pallas_call(
        kernel,
        out_shape=jax.ShapeDtypeStruct((rows_k, lane_w), x.dtype),
        grid_spec=pltpu.PrefetchScalarGridSpec(
            num_scalar_prefetch=0,
            grid=grid,
            in_specs=in_specs,
            out_specs=pl.BlockSpec((row_tile, lane_w), lambda i: (i, 0)),
        ),
        compiler_params=pltpu.CompilerParams(
            dimension_semantics=("parallel",),
            vmem_limit_bytes=vmem_limit,
        ),
        cost_estimate=cost,
    )(*args)

    return out.reshape(orig_shape)


def layernorm_ref(x, gamma, beta, eps=1e-6):
    """Pure-JAX reference matching the PyTorch forward exactly."""
    x32 = x.astype(jnp.float32)
    mean = jnp.mean(x32, axis=-1, keepdims=True)
    var = jnp.sum((x32 - mean) ** 2, axis=-1, keepdims=True) / (x.shape[-1] - 1)
    std = jnp.sqrt(var)
    return ((x32 - mean) * gamma.astype(jnp.float32) / (std + eps)
            + beta.astype(jnp.float32)).astype(x.dtype)


if __name__ == "__main__":
    key = jax.random.PRNGKey(0)

    # --- Case 1: module-default init, small H (lane-dense packing, groups=4) ---
    B, S, H = 2, 8, 32
    x = jax.random.normal(key, (B, S, H), dtype=jnp.float32)
    gamma = jnp.ones((H,), dtype=jnp.float32)   # nn.Parameter(torch.ones(features))
    beta = jnp.zeros((H,), dtype=jnp.float32)   # nn.Parameter(torch.zeros(features))

    out = jax.block_until_ready(layernorm_pallas(x, gamma, beta, eps=1e-6))
    ref = layernorm_ref(x, gamma, beta, eps=1e-6)
    assert out.shape == x.shape and out.dtype == x.dtype
    assert jnp.allclose(out, ref, atol=1e-3, rtol=1e-3), "mismatch (small-H case)"

    # --- Case 2: lane-aligned H, non-trivial affine params (plain path) --------
    k1, k2, k3 = jax.random.split(jax.random.PRNGKey(1), 3)
    B2, S2, H2 = 4, 64, 256
    x2 = jax.random.normal(k1, (B2, S2, H2), dtype=jnp.float32)
    gamma2 = 1.0 + 0.1 * jax.random.normal(k2, (H2,), dtype=jnp.float32)
    beta2 = 0.1 * jax.random.normal(k3, (H2,), dtype=jnp.float32)

    out2 = jax.block_until_ready(layernorm_pallas(x2, gamma2, beta2, eps=1e-6))
    ref2 = layernorm_ref(x2, gamma2, beta2, eps=1e-6)
    assert out2.shape == x2.shape and out2.dtype == x2.dtype
    assert jnp.allclose(out2, ref2, atol=1e-3, rtol=1e-3), "mismatch (H=256 case)"

    # --- Case 3: odd H (48) exercises generalized grouping (groups=8) ----------
    k4, k5, k6 = jax.random.split(jax.random.PRNGKey(2), 3)
    B3, S3, H3 = 3, 8, 48
    x3 = 2.0 + jax.random.normal(k4, (B3, S3, H3), dtype=jnp.float32)  # nonzero mean
    gamma3 = 1.0 + 0.1 * jax.random.normal(k5, (H3,), dtype=jnp.float32)
    beta3 = 0.1 * jax.random.normal(k6, (H3,), dtype=jnp.float32)

    out3 = jax.block_until_ready(layernorm_pallas(x3, gamma3, beta3, eps=1e-6))
    ref3 = layernorm_ref(x3, gamma3, beta3, eps=1e-6)
    assert out3.shape == x3.shape and out3.dtype == x3.dtype
    assert jnp.allclose(out3, ref3, atol=1e-3, rtol=1e-3), "mismatch (H=48 case)"

    # --- Case 4: bf16 activations (plain path, 16-bit sublane packing) ---------
    k7 = jax.random.PRNGKey(3)
    x4 = jax.random.normal(k7, (2, 16, 128), dtype=jnp.bfloat16)
    gamma4 = jnp.ones((128,), dtype=jnp.float32)
    beta4 = jnp.zeros((128,), dtype=jnp.float32)

    out4 = jax.block_until_ready(layernorm_pallas(x4, gamma4, beta4, eps=1e-6))
    ref4 = layernorm_ref(x4, gamma4, beta4, eps=1e-6)
    assert out4.shape == x4.shape and out4.dtype == x4.dtype
    assert jnp.allclose(out4.astype(jnp.float32), ref4.astype(jnp.float32),
                        atol=3e-2, rtol=3e-2), "mismatch (bf16 case)"

    print("KERNEL_OK")
</pallas_src>

<mosaic_0001>
module attributes {stable_mosaic.version = 11 : i64} {
  func.func @_layernorm_grouped_kernel(%arg0: i32, %arg1: memref<8x128xf32, #tpu.memory_space<vmem>>, %arg2: memref<1x128xf32, #tpu.memory_space<vmem>>, %arg3: memref<1x128xf32, #tpu.memory_space<vmem>>, %arg4: memref<128x128xf32, #tpu.memory_space<vmem>>, %arg5: memref<8x128xf32, #tpu.memory_space<vmem>>) attributes {dimension_semantics = [#tpu.dimension_semantics<parallel>], iteration_bounds = array<i64: 1>, scalar_prefetch = 0 : i64, scratch_operands = 0 : i64, tpu.core_type = #tpu.core_type<tc>, window_params = [{transform_indices = @transform_0, window_bounds = array<i64: 8, 128>}, {pipeline_mode = #tpu.pipeline_mode<synchronous>, transform_indices = @transform_1, window_bounds = array<i64: 1, 128>}, {pipeline_mode = #tpu.pipeline_mode<synchronous>, transform_indices = @transform_2, window_bounds = array<i64: 1, 128>}, {pipeline_mode = #tpu.pipeline_mode<synchronous>, transform_indices = @transform_3, window_bounds = array<i64: 128, 128>}, {transform_indices = @transform_4, window_bounds = array<i64: 8, 128>}]} {
    %c0 = arith.constant 0 : index
    %c0_0 = arith.constant 0 : index
    %0 = vector.load %arg1[%c0, %c0_0] : memref<8x128xf32, #tpu.memory_space<vmem>>, vector<8x128xf32>
    %c0_1 = arith.constant 0 : index
    %c0_2 = arith.constant 0 : index
    %1 = vector.load %arg4[%c0_1, %c0_2] : memref<128x128xf32, #tpu.memory_space<vmem>>, vector<128x128xf32>
    %cst = arith.constant dense<0.000000e+00> : vector<8x128xf32>
    %2 = tpu.matmul %0, %1, %cst {dimension_numbers = #tpu.dot_dimension_numbers<[1], [0], [0], [1], [0, 0, 1, 1], [], []>, precision = #tpu.contract_precision<fp32>} : vector<8x128xf32>, vector<128x128xf32>, vector<8x128xf32> -> vector<8x128xf32>
    %cst_3 = arith.constant 3.125000e-02 : f32
    %3 = vector.broadcast %cst_3 : f32 to vector<8x128xf32>
    %4 = arith.mulf %2, %3 : vector<8x128xf32>
    %5 = arith.subf %0, %4 : vector<8x128xf32>
    %6 = arith.mulf %5, %5 : vector<8x128xf32>
    %cst_4 = arith.constant dense<0.000000e+00> : vector<8x128xf32>
    %7 = tpu.matmul %6, %1, %cst_4 {dimension_numbers = #tpu.dot_dimension_numbers<[1], [0], [0], [1], [0, 0, 1, 1], [], []>, precision = #tpu.contract_precision<fp32>} : vector<8x128xf32>, vector<128x128xf32>, vector<8x128xf32> -> vector<8x128xf32>
    %cst_5 = arith.constant 0.0322580636 : f32
    %8 = vector.broadcast %cst_5 : f32 to vector<8x128xf32>
    %9 = arith.mulf %7, %8 : vector<8x128xf32>
    %cst_6 = arith.constant 0.000000e+00 : f32
    %10 = vector.broadcast %cst_6 : f32 to vector<8x128xf32>
    %11 = arith.maximumf %9, %10 : vector<8x128xf32>
    %12 = math.sqrt %11 : vector<8x128xf32>
    %cst_7 = arith.constant 9.99999997E-7 : f32
    %13 = vector.broadcast %cst_7 : f32 to vector<8x128xf32>
    %14 = arith.addf %12, %13 : vector<8x128xf32>
    %cst_8 = arith.constant 1.000000e+00 : f32
    %15 = vector.broadcast %cst_8 : f32 to vector<8x128xf32>
    %16 = arith.divf %15, %14 : vector<8x128xf32>
    %c0_9 = arith.constant 0 : index
    %c0_10 = arith.constant 0 : index
    %17 = vector.load %arg2[%c0_9, %c0_10] : memref<1x128xf32, #tpu.memory_space<vmem>>, vector<1x128xf32>
    %c0_11 = arith.constant 0 : index
    %c0_12 = arith.constant 0 : index
    %18 = vector.load %arg3[%c0_11, %c0_12] : memref<1x128xf32, #tpu.memory_space<vmem>>, vector<1x128xf32>
    %19 = arith.mulf %5, %16 : vector<8x128xf32>
    %20 = vector.broadcast %17 : vector<1x128xf32> to vector<8x128xf32>
    %21 = arith.mulf %19, %20 : vector<8x128xf32>
    %22 = vector.broadcast %18 : vector<1x128xf32> to vector<8x128xf32>
    %23 = arith.addf %21, %22 : vector<8x128xf32>
    %c0_13 = arith.constant 0 : index
    %c0_14 = arith.constant 0 : index
    %24 = vector.load %arg5[%c0_13, %c0_14] : memref<8x128xf32, #tpu.memory_space<vmem>>, vector<8x128xf32>
    tpu.vector_store %arg5[%c0_13, %c0_14], %23 {strides = array<i32>} : memref<8x128xf32, #tpu.memory_space<vmem>>, vector<8x128xf32>,
    return
  }
  func.func @transform_0(%arg0: i32) -> (i32, i32) {
    %c0_i32 = arith.constant 0 : i32
    %c0_i32_0 = arith.constant 0 : i32
    return %arg0, %c0_i32 : i32, i32
  }
  func.func @transform_1(%arg0: i32) -> (i32, i32) {
    %c0_i32 = arith.constant 0 : i32
    %c0_i32_0 = arith.constant 0 : i32
    %c0_i32_1 = arith.constant 0 : i32
    return %c0_i32, %c0_i32_0 : i32, i32
  }
  func.func @transform_2(%arg0: i32) -> (i32, i32) {
    %c0_i32 = arith.constant 0 : i32
    %c0_i32_0 = arith.constant 0 : i32
    %c0_i32_1 = arith.constant 0 : i32
    return %c0_i32, %c0_i32_0 : i32, i32
  }
  func.func @transform_3(%arg0: i32) -> (i32, i32) {
    %c0_i32 = arith.constant 0 : i32
    %c0_i32_0 = arith.constant 0 : i32
    %c0_i32_1 = arith.constant 0 : i32
    return %c0_i32, %c0_i32_0 : i32, i32
  }
  func.func @transform_4(%arg0: i32) -> (i32, i32) {
    %c0_i32 = arith.constant 0 : i32
    %c0_i32_0 = arith.constant 0 : i32
    return %arg0, %c0_i32 : i32, i32
  }
}

</mosaic_0001>

<bundles_post_ra>
// kernel: tpu_custom_call.1
= control target key start
LH: loop header
LB: loop body
LE: loop exit
PB: predicated region body
PF: predicated region fallthrough
CT: control target
= control target key end

     0   :  { %9 = vsyncpa [#allocation3], 0  ;;  %s2890_s0 = inlined_call_operand.hbm [shape: f32[4,128], index: 0, kind: input, shape index: {}]   ;;  %s2891_s1 = inlined_call_operand.vmem [shape: f32[1,128], index: 1, kind: input, shape index: {}]   ;;  %s2892_s2 = inlined_call_operand.vmem [shape: f32[1,128], index: 2, kind: input, shape index: {}]   ;;  %s2893_s3 = inlined_call_operand.hbm [shape: f32[128,128], index: 3, kind: input, shape index: {}]   ;;  %s2894_s4 = inlined_call_operand.hbm [shape: f32[4,128], index: 4, kind: output, shape index: {}]  }
   0x1   :  { %10 = vsyncpa [#allocation6], 0 }
   0x2   :  { %11 = vsyncpa [#allocation4], 0 }
   0x3   :  { %16 = vsyncadd [#allocation3], 64  ;;  %s2416_s15 = smov [#allocation2]   ;;  %s2344_s19 = scalar_lea.hbm %s2890_s0, 64 }
   0x4   :  { %s17_s16 = sshll.u32 %s2416_s15, 4  ;;  %p2345_p0 = scmp.ne.s32.totalorder %s2890_s0, %s2344_s19  ;;  %s18_s16 = int_to_ptr.vmem [resolvable:$true] %s17_s16 }
   0x5   :  { %p2348_p1 = scmp.lt.u32.totalorder %s2344_s19, %s2890_s0 }
   0x7   :  { %p2350_p2 = pnand %p2348_p1, %p2345_p0 }
   0x9   :  { %2353 = shalt.err (!%p2350_p2)
}
   0xa   :  { %s2354_s24 = scalar_lea.vmem %s18_s16, 64  ;;  %s2358_s25 = scalar_lea.vmem %s18_s16, 128 }
   0xb   :  { %p2355_p3 = scmp.ne.s32.totalorder %s18_s16, %s2354_s24  ;;  %p2359_p4 = scmp.lt.s32.totalorder %s18_s16, %s18_s16 }
   0xc   :  { %p2360_p5 = scmp.lt.s32.totalorder %s2358_s25, %s2354_s24 }
   0xe   :  { %p2361_p6 = por %p2360_p5, %p2359_p4 }
  0x10   :  { %p2362_p7 = pnand %p2361_p6, %p2355_p3 }
  0x12   :  { %2365 = shalt.err (!%p2362_p7)
}
  0x13   :  { %s2417_s26 = smov 64   ;;  %s2418_s27 = smov 4  }
  0x14   :  { %23 = dma.hbm_to_vmem [thread:$0]  %s2890_s0, 64, %s18_s16, [#allocation3], %s2417_s26, %s2417_s26, %s2418_s27  }
  0x15   :  { %s2419_s30 = smov [#allocation5]   ;;  %s2366_s8 = scalar_lea.hbm %s2893_s3, 2048 }
  0x16   :  { %s33_s5 = sshll.u32 %s2419_s30, 4  ;;  %p2367_p8 = scmp.ne.s32.totalorder %s2893_s3, %s2366_s8  ;;  %s34_s5 = int_to_ptr.vmem [resolvable:$true] %s33_s5 }
  0x17   :  { %p2370_p9 = scmp.lt.u32.totalorder %s2366_s8, %s2893_s3 }
  0x19   :  { %p2372_p10 = pnand %p2370_p9, %p2367_p8 }
  0x1b   :  { %2375 = shalt.err (!%p2372_p10)
}
  0x1c   :  { %s2376_s13 = scalar_lea.vmem %s34_s5, 2048  ;;  %p2381_p12 = scmp.lt.s32.totalorder %s34_s5, %s34_s5 }
  0x1d   :  { %p2377_p11 = scmp.ne.s32.totalorder %s34_s5, %s2376_s13  ;;  %p2382_p13 = scmp.lt.s32.totalorder %s2376_s13, %s2376_s13 }
  0x1f   :  { %p2383_p0 = por %p2382_p13, %p2381_p12 }
  0x21   :  { %p2384_p1 = pnand %p2383_p0, %p2377_p11 }
  0x23   :  { %2387 = shalt.err (!%p2384_p1)
}
  0x24   :  { %s2420_s0 = smov 128   ;;  %s2421_s14 = smov 8  }
  0x25   :  { %39 = dma.hbm_to_vmem [thread:$0]  %s2893_s3, 2048, %s34_s5, [#allocation6], %s2420_s0, %s2420_s0, %s2421_s14  }
  0x26   :  { %2410 = dma.done.wait [#allocation3], 128  }
  0x27   :  { %2411 = vsyncadd [#allocation3], 4294967168 }
  0x28   :  { %2412 = dma.done.wait [#allocation6], 2048  }
  0x29   :  { %2413 = vsyncadd [#allocation6], 4294965248  ;;  %v2422_v0 = vmov 0.0|0.0   ;;  %vm2423_vm0 = vmmov 0   ;;  %v2424_v1 = vmov 0.0   ;;  %v47_v2 = vld [vmem:[#allocation5] sm:$0xff] }
  0x2a   :  { %2022 = vmatprep.subr.bf16.mxu0 %v2422_v0  ;;  %1634 = vmatprep.mubr.msk.f32.mxu0 %vm2423_vm0, %v2424_v1  ;;  %v48_v3 = vld [vmem:[#allocation5 + $0x8] sm:$0xff]  ;;  %v49_v4 = vld [vmem:[#allocation5 + $0x10] sm:$0xff]  ;;  %v64_v5 = vand.u32 4294901760, %v47_v2  ;;  %v50_v7 = vld [vmem:[#allocation5 + $0x18] sm:$0xff] }
  0x2b   :  { %2166 = vmatprep.subr.bf16.mxu1 %v2422_v0  ;;  %1844 = vmatprep.mubr.msk.f32.mxu1 %vm2423_vm0, %v2424_v1  ;;  %v67_v6 = vand.u32 4294901760, %v48_v3  ;;  %v70_v8 = vand.u32 4294901760, %v49_v4  ;;  %v73_v9 = vand.u32 4294901760, %v50_v7  ;;  %v51_v10 = vld [vmem:[#allocation5 + $0x20] sm:$0xff]  ;;  %v52_v11 = vld [vmem:[#allocation5 + $0x28] sm:$0xff]  ;;  %v53_v16 = vld [vmem:[#allocation5 + $0x30] sm:$0xff] }
  0x2c   :  { %v76_v14 = vand.u32 4294901760, %v51_v10  ;;  %v79_v15 = vand.u32 4294901760, %v52_v11  ;;  %v54_v17 = vld [vmem:[#allocation5 + $0x38] sm:$0xff]  ;;  %v82_v19 = vand.u32 4294901760, %v53_v16  ;;  %v55_v21 = vld [vmem:[#allocation5 + $0x40] sm:$0xff]  ;;  %v56_v23 = vld [vmem:[#allocation5 + $0x48] sm:$0xff]  ;;  %v2506_v34 = vsub.f32 %v47_v2, %v64_v5 }
  0x2d   :  { %v2484_v12 = vpack.c.bf16 %v67_v6, %v64_v5  ;;  %v2487_v13 = vpack.c.bf16 %v73_v9, %v70_v8  ;;  %v85_v20 = vand.u32 4294901760, %v54_v17  ;;  %v2495_v22 = vld [vmem:[#allocation2] sm:$0xff]  ;;  %v57_v24 = vld [vmem:[#allocation5 + $0x50] sm:$0xff]  ;;  %v59_v26 = vld [vmem:[#allocation5 + $0x60] sm:$0xff]  ;;  %v88_v27 = vand.u32 4294901760, %v55_v21 }
  0x2e   :  { %v2493_v18 = vpack.c.bf16 %v79_v15, %v76_v14  ;;  %v58_v25 = vld [vmem:[#allocation5 + $0x58] sm:$0xff]  ;;  %v60_v28 = vld [vmem:[#allocation5 + $0x68] sm:$0xff]  ;;  %v61_v29 = vld [vmem:[#allocation5 + $0x70] sm:$0xff]  ;;  %v2501_v31 = vand.u32 4294901760, %v2495_v22  ;;  %v91_v33 = vand.u32 4294901760, %v56_v23  ;;  %v2508_v35 = vsub.f32 %v48_v3, %v67_v6 }
  0x2f   :  { %2024 = vmatpush3.bf16.msra.mxu0 %v2484_v12  ;;  %2168 = vmatpush3.bf16.msra.mxu1 %v2484_v12  ;;  %v62_v30 = vld [vmem:[#allocation5 + $0x78] sm:$0xff]  ;;  %v2504_v32 = vpack.c.bf16 %v85_v20, %v82_v19  ;;  %v94_v36 = vand.u32 4294901760, %v57_v24  ;;  %v97_v37 = vand.u32 4294901760, %v58_v25  ;;  %v100_v38 = vand.u32 4294901760, %v59_v26 }
  0x30   :  { %2025 = vmatprep.subr.bf16.mxu0 %v2422_v0  ;;  %2169 = vmatprep.subr.bf16.mxu1 %v2422_v0  ;;  %v103_v39 = vand.u32 4294901760, %v60_v28  ;;  %v106_v40 = vand.u32 4294901760, %v61_v29  ;;  %v109_v41 = vand.u32 4294901760, %v62_v30  ;;  %v2515_v42 = vsub.f32 %v2495_v22, %v2501_v31 }
  0x31   :  { %v2517_v43 = vsub.f32 %v49_v4, %v70_v8  ;;  %v2520_v44 = vpack.c.bf16 %v91_v33, %v88_v27  ;;  %v157_v45 = vand.u32 4294901760, %v2506_v34  ;;  %v164_v46 = vand.u32 4294901760, %v2508_v35 }
  0x32   :  { %v2524_v47 = vsub.f32 %v50_v7, %v73_v9  ;;  %v2528_v48 = vsub.f32 %v51_v10, %v76_v14  ;;  %v2531_v49 = vpack.c.bf16 %v97_v37, %v94_v36  ;;  %v2533_v50 = vpack.c.bf16 %v103_v39, %v100_v38 }
  0x33   :  { %2027 = vmatpush3.bf16.msra.mxu0 %v2487_v13  ;;  %2171 = vmatpush3.bf16.msra.mxu1 %v2487_v13  ;;  %v2535_v51 = vpack.c.bf16 %v109_v41, %v106_v40  ;;  %v146_v52 = vand.u32 4294901760, %v2515_v42  ;;  %v171_v53 = vand.u32 4294901760, %v2517_v43  ;;  %v2539_v54 = vsub.f32 %v52_v11, %v79_v15 }
  0x34   :  { %2028 = vmatprep.subr.bf16.mxu0 %v2422_v0  ;;  %2172 = vmatprep.subr.bf16.mxu1 %v2422_v0  ;;  %v2541_v55 = vsub.f32 %v53_v16, %v82_v19  ;;  %v158_v56 = vsub.f32 %v2506_v34, %v157_v45  ;;  %v165_v57 = vsub.f32 %v2508_v35, %v164_v46  ;;  %v178_v58 = vand.u32 4294901760, %v2524_v47 }
  0x35   :  { %v2547_v59 = vsub.f32 %v54_v17, %v85_v20  ;;  %v185_v60 = vand.u32 4294901760, %v2528_v48  ;;  %v2552_v61 = vsub.f32 %v55_v21, %v88_v27  ;;  %v2554_v62 = vsub.f32 %v56_v23, %v91_v33 }
  0x36   :  { %v2556_v63 = vsub.f32 %v57_v24, %v94_v36  ;;  %v2559_v2 = vsub.f32 %v58_v25, %v97_v37  ;;  %v2561_v3 = vsub.f32 %v59_v26, %v100_v38  ;;  %v2563_v4 = vsub.f32 %v60_v28, %v103_v39 }
  0x37   :  { %2030 = vmatpush3.bf16.msra.mxu0 %v2493_v18  ;;  %2174 = vmatpush3.bf16.msra.mxu1 %v2493_v18  ;;  %v2565_v5 = vsub.f32 %v61_v29, %v106_v40  ;;  %v147_v6 = vsub.f32 %v2515_v42, %v146_v52  ;;  %v172_v7 = vsub.f32 %v2517_v43, %v171_v53  ;;  %v192_v8 = vand.u32 4294901760, %v2539_v54 }
  0x38   :  { %2031 = vmatprep.subr.bf16.mxu0 %v2422_v0  ;;  %2175 = vmatprep.subr.bf16.mxu1 %v2422_v0  ;;  %v2572_v9 = vsub.f32 %v62_v30, %v109_v41  ;;  %v159_v10 = vand.u32 4294901760, %v158_v56  ;;  %v166_v11 = vand.u32 4294901760, %v165_v57  ;;  %v179_v14 = vsub.f32 %v2524_v47, %v178_v58 }
  0x39   :  { %v199_v15 = vand.u32 4294901760, %v2541_v55  ;;  %v206_v16 = vand.u32 4294901760, %v2547_v59  ;;  %v213_v17 = vand.u32 4294901760, %v2552_v61  ;;  %v220_v19 = vand.u32 4294901760, %v2554_v62 }
  0x3a   :  { %v227_v20 = vand.u32 4294901760, %v2556_v63  ;;  %v234_v21 = vand.u32 4294901760, %v2559_v2  ;;  %v241_v23 = vand.u32 4294901760, %v2561_v3  ;;  %v248_v24 = vand.u32 4294901760, %v2563_v4 }
  0x3b   :  { %2033 = vmatpush3.bf16.msra.mxu0 %v2504_v32  ;;  %2177 = vmatpush3.bf16.msra.mxu1 %v2504_v32  ;;  %v255_v25 = vand.u32 4294901760, %v2565_v5  ;;  %v262_v26 = vand.u32 4294901760, %v2572_v9  ;;  %v2589_v27 = vpack.c.bf16 %v164_v46, %v157_v45  ;;  %v2591_v28 = vpack.c.bf16 %v178_v58, %v171_v53 }
  0x3c   :  { %2034 = vmatprep.subr.bf16.mxu0 %v2422_v0  ;;  %2178 = vmatprep.subr.bf16.mxu1 %v2422_v0  ;;  %v2593_v29 = vpack.c.bf16 %v192_v8, %v185_v60  ;;  %v2596_v30 = vpack.c.bf16 %v206_v16, %v199_v15  ;;  %v2598_v33 = vpack.c.bf16 %v220_v19, %v213_v17  ;;  %v148_v39 = vand.u32 4294901760, %v147_v6 }
  0x3d   :  { %v2600_v36 = vpack.c.bf16 %v234_v21, %v227_v20  ;;  %v2602_v37 = vpack.c.bf16 %v248_v24, %v241_v23  ;;  %v2605_v38 = vpack.c.bf16 %v262_v26, %v255_v25  ;;  %v186_v40 = vsub.f32 %v2528_v48, %v185_v60 }
  0x3e   :  { %v2611_v41 = vpack.c.bf16 %v166_v11, %v159_v10  ;;  %v173_v45 = vand.u32 4294901760, %v172_v7  ;;  %v180_v46 = vand.u32 4294901760, %v179_v14  ;;  %v193_v53 = vsub.f32 %v2539_v54, %v192_v8 }
  0x3f   :  { %2036 = vmatpush3.bf16.msra.mxu0 %v2520_v44  ;;  %2180 = vmatpush3.bf16.msra.mxu1 %v2520_v44  ;;  %v200_v56 = vsub.f32 %v2541_v55, %v199_v15  ;;  %v187_v58 = vand.u32 4294901760, %v186_v40  ;;  %v207_v6 = vsub.f32 %v2547_v59, %v206_v16  ;;  %v214_v11 = vsub.f32 %v2552_v61, %v213_v17 }
  0x40   :  { %2037 = vmatprep.subr.bf16.mxu0 %v2422_v0  ;;  %2181 = vmatprep.subr.bf16.mxu1 %v2422_v0  ;;  %v2619_v57 = vpack.c.bf16 %v180_v46, %v173_v45  ;;  %v194_v60 = vand.u32 4294901760, %v193_v53  ;;  %v221_v14 = vsub.f32 %v2554_v62, %v220_v19  ;;  %v228_v15 = vsub.f32 %v2556_v63, %v227_v20 }
  0x41   :  { %v201_v7 = vand.u32 4294901760, %v200_v56  ;;  %v208_v10 = vand.u32 4294901760, %v207_v6  ;;  %v235_v45 = vsub.f32 %v2559_v2, %v234_v21  ;;  %v242_v46 = vsub.f32 %v2561_v3, %v241_v23 }
  0x42   :  { %v2626_v8 = vpack.c.bf16 %v194_v60, %v187_v58  ;;  %v222_v40 = vand.u32 4294901760, %v221_v14  ;;  %v229_v19 = vand.u32 4294901760, %v228_v15  ;;  %v249_v20 = vsub.f32 %v2563_v4, %v248_v24 }
  0x43   :  { %2039 = vmatpush3.bf16.msra.mxu0 %v2531_v49  ;;  %2183 = vmatpush3.bf16.msra.mxu1 %v2531_v49  ;;  %v2633_v16 = vpack.c.bf16 %v208_v10, %v201_v7  ;;  %v236_v53 = vand.u32 4294901760, %v235_v45  ;;  %v256_v56 = vsub.f32 %v2565_v5, %v255_v25  ;;  %v243_v21 = vand.u32 4294901760, %v242_v46 }
  0x44   :  { %2040 = vmatprep.subr.bf16.mxu0 %v2422_v0  ;;  %2184 = vmatprep.subr.bf16.mxu1 %v2422_v0  ;;  %v250_v60 = vand.u32 4294901760, %v249_v20  ;;  %v263_v23 = vsub.f32 %v2572_v9, %v262_v26  ;;  %v2660_v26 = vpack.c.bf16 %v2508_v35, %v2506_v34  ;;  %v2667_v10 = vpack.c.bf16 %v2524_v47, %v2517_v43 }
  0x45   :  { %v2645_v58 = vpack.c.bf16 %v236_v53, %v229_v19  ;;  %v257_v7 = vand.u32 4294901760, %v256_v56  ;;  %v2675_v34 = vpack.c.bf16 %v2539_v54, %v2528_v48  ;;  %v2681_v35 = vpack.c.bf16 %v2547_v59, %v2541_v55 }
  0x46   :  { %v2650_v6 = vpack.c.bf16 %v250_v60, %v243_v21  ;;  %v264_v24 = vand.u32 4294901760, %v263_v23  ;;  %v2687_v43 = vpack.c.bf16 %v2554_v62, %v2552_v61  ;;  %v2693_v47 = vpack.c.bf16 %v2559_v2, %v2556_v63 }
  0x47   :  { %2042 = vmatpush3.bf16.msra.mxu0 %v2533_v50  ;;  %2186 = vmatpush3.bf16.msra.mxu1 %v2533_v50  ;;  %v2699_v48 = vpack.c.bf16 %v2563_v4, %v2561_v3  ;;  %v2705_v54 = vpack.c.bf16 %v2572_v9, %v2565_v5  ;;  %v1397_v9 = vld [vmem:[%s2892_s2] ss:$0 sm:$0xff] }
  0x48   :  { %2043 = vmatprep.subr.bf16.mxu0 %v2422_v0  ;;  %2187 = vmatprep.subr.bf16.mxu1 %v2422_v0  ;;  %v2654_v25 = vpack.c.bf16 %v264_v24, %v257_v7 }
  0x4b   :  { %2045 = vmatpush3.bf16.msra.mxu0 %v2535_v51  ;;  %2189 = vmatpush3.bf16.msra.mxu1 %v2535_v51 }
  0x4c   :  { %2046 = vmatprep.subr.bf16.mxu0 %v2422_v0  ;;  %2190 = vmatprep.subr.bf16.mxu1 %v2422_v0 }
  0x4e   :  { %1635 = vmatmul.mubr.f32.vlgmr.msra.gmra.mrb[0].mxu0 %v148_v39  ;;  %v215_v39 = vand.u32 4294901760, %v214_v11 }
  0x4f   :  { %2048 = vmatpush3.bf16.msra.mxu0 %v2611_v41  ;;  %1669 = vmatprep.mubr.msk.f32.mxu0 %vm2423_vm0, %v2424_v1 }
  0x50   :  { %2049 = vmatprep.subr.bf16.mxu0 %v2422_v0  ;;  %v2639_v17 = vpack.c.bf16 %v222_v40, %v215_v39 }
  0x53   :  { %2051 = vmatpush3.bf16.msra.mxu0 %v2619_v57 }
  0x54   :  { %2052 = vmatprep.subr.bf16.mxu0 %v2422_v0 }
  0x57   :  { %2054 = vmatpush3.bf16.msra.mxu0 %v2626_v8 }
  0x58   :  { %2055 = vmatprep.subr.bf16.mxu0 %v2422_v0 }
  0x5b   :  { %2057 = vmatpush3.bf16.msra.mxu0 %v2633_v16 }
  0x5c   :  { %2058 = vmatprep.subr.bf16.mxu0 %v2422_v0 }
  0x5f   :  { %2060 = vmatpush3.bf16.msra.mxu0 %v2639_v17 }
  0x60   :  { %2061 = vmatprep.subr.bf16.mxu0 %v2422_v0 }
  0x63   :  { %2063 = vmatpush3.bf16.msra.mxu0 %v2645_v58 }
  0x64   :  { %2064 = vmatprep.subr.bf16.mxu0 %v2422_v0 }
  0x67   :  { %2066 = vmatpush3.bf16.msra.mxu0 %v2650_v6 }
  0x68   :  { %2067 = vmatprep.subr.bf16.mxu0 %v2422_v0 }
  0x6b   :  { %2069 = vmatpush3.bf16.msra.mxu0 %v2654_v25 }
  0x6c   :  { %2070 = vmatprep.subr.bf16.mxu0 %v2422_v0 }
  0x6e   :  { %1670 = vmatmul.mubr.f32.vlgmr.msra.gmra.mrb[0].mxu0 %v2501_v31 }
  0x6f   :  { %2072 = vmatpush3.bf16.msra.mxu0 %v2660_v26  ;;  %1704 = vmatprep.mubr.msk.f32.mxu0 %vm2423_vm0, %v2424_v1 }
  0x70   :  { %2073 = vmatprep.subr.bf16.mxu0 %v2422_v0 }
  0x73   :  { %2075 = vmatpush3.bf16.msra.mxu0 %v2667_v10 }
  0x74   :  { %2076 = vmatprep.subr.bf16.mxu0 %v2422_v0 }
  0x77   :  { %2078 = vmatpush3.bf16.msra.mxu0 %v2675_v34 }
  0x78   :  { %2079 = vmatprep.subr.bf16.mxu0 %v2422_v0 }
  0x7b   :  { %2081 = vmatpush3.bf16.msra.mxu0 %v2681_v35 }
  0x7c   :  { %2082 = vmatprep.subr.bf16.mxu0 %v2422_v0 }
  0x7f   :  { %2084 = vmatpush3.bf16.msra.mxu0 %v2687_v43 }
  0x80   :  { %2085 = vmatprep.subr.bf16.mxu0 %v2422_v0 }
  0x83   :  { %2087 = vmatpush3.bf16.msra.mxu0 %v2693_v47 }
  0x84   :  { %2088 = vmatprep.subr.bf16.mxu0 %v2422_v0 }
  0x87   :  { %2090 = vmatpush3.bf16.msra.mxu0 %v2699_v48 }
  0x88   :  { %2091 = vmatprep.subr.bf16.mxu0 %v2422_v0 }
  0x8b   :  { %2093 = vmatpush3.bf16.msra.mxu0 %v2705_v54 }
  0x8c   :  { %2094 = vmatprep.subr.bf16.mxu0 %v2422_v0 }
  0x8e   :  { %1705 = vmatmul.mubr.f32.vlgmr.msra.gmra.mrb[0].mxu0 %v2515_v42 }
  0x8f   :  { %2096 = vmatpush3.bf16.msra.mxu0 %v2484_v12  ;;  %1739 = vmatprep.mubr.msk.f32.mxu0 %vm2423_vm0, %v2424_v1 }
  0x90   :  { %2097 = vmatprep.subr.bf16.mxu0 %v2422_v0 }
  0x93   :  { %2099 = vmatpush3.bf16.msra.mxu0 %v2487_v13 }
  0x94   :  { %2100 = vmatprep.subr.bf16.mxu0 %v2422_v0 }
  0x97   :  { %2102 = vmatpush3.bf16.msra.mxu0 %v2493_v18 }
  0x98   :  { %2103 = vmatprep.subr.bf16.mxu0 %v2422_v0 }
  0x9b   :  { %2105 = vmatpush3.bf16.msra.mxu0 %v2504_v32 }
  0x9c   :  { %2106 = vmatprep.subr.bf16.mxu0 %v2422_v0 }
  0x9f   :  { %2108 = vmatpush3.bf16.msra.mxu0 %v2520_v44 }
  0xa0   :  { %2109 = vmatprep.subr.bf16.mxu0 %v2422_v0 }
  0xa3   :  { %2111 = vmatpush3.bf16.msra.mxu0 %v2531_v49 }
  0xa4   :  { %2112 = vmatprep.subr.bf16.mxu0 %v2422_v0 }
  0xa7   :  { %2114 = vmatpush3.bf16.msra.mxu0 %v2533_v50 }
  0xa8   :  { %2115 = vmatprep.subr.bf16.mxu0 %v2422_v0 }
  0xab   :  { %2117 = vmatpush3.bf16.msra.mxu0 %v2535_v51 }
  0xac   :  { %2118 = vmatprep.subr.bf16.mxu0 %v2422_v0 }
  0xae   :  { %1740 = vmatmul.mubr.f32.vlgmr.msra.gmra.mrb[0].mxu0 %v146_v52 }
  0xaf   :  { %2120 = vmatpush3.bf16.msra.mxu0 %v2589_v27  ;;  %1774 = vmatprep.mubr.msk.f32.mxu0 %vm2423_vm0, %v2424_v1 }
  0xb0   :  { %2121 = vmatprep.subr.bf16.mxu0 %v2422_v0 }
  0xb3   :  { %2123 = vmatpush3.bf16.msra.mxu0 %v2591_v28 }
  0xb4   :  { %2124 = vmatprep.subr.bf16.mxu0 %v2422_v0 }
  0xb7   :  { %2126 = vmatpush3.bf16.msra.mxu0 %v2593_v29 }
  0xb8   :  { %2127 = vmatprep.subr.bf16.mxu0 %v2422_v0 }
  0xbb   :  { %2129 = vmatpush3.bf16.msra.mxu0 %v2596_v30 }
  0xbc   :  { %2130 = vmatprep.subr.bf16.mxu0 %v2422_v0 }
  0xbf   :  { %2132 = vmatpush3.bf16.msra.mxu0 %v2598_v33 }
  0xc0   :  { %2133 = vmatprep.subr.bf16.mxu0 %v2422_v0 }
  0xc3   :  { %2135 = vmatpush3.bf16.msra.mxu0 %v2600_v36 }
  0xc4   :  { %2136 = vmatprep.subr.bf16.mxu0 %v2422_v0 }
  0xc7   :  { %2138 = vmatpush3.bf16.msra.mxu0 %v2602_v37 }
  0xc8   :  { %2139 = vmatprep.subr.bf16.mxu0 %v2422_v0 }
  0xcb   :  { %2141 = vmatpush3.bf16.msra.mxu0 %v2605_v38 }
  0xcc   :  { %2142 = vmatprep.subr.bf16.mxu0 %v2422_v0 }
  0xce   :  { %1775 = vmatmul.mubr.f32.vlgmr.msra.gmra.mrb[0].mxu0 %v2501_v31 }
  0xcf   :  { %2144 = vmatpush3.bf16.msra.mxu0 %v2484_v12  ;;  %1809 = vmatprep.mubr.msk.f32.mxu0 %vm2423_vm0, %v2424_v1 }
  0xd0   :  { %2145 = vmatprep.subr.bf16.mxu0 %v2422_v0 }
  0xd3   :  { %2147 = vmatpush3.bf16.msra.mxu0 %v2487_v13 }
  0xd4   :  { %2148 = vmatprep.subr.bf16.mxu0 %v2422_v0 }
  0xd7   :  { %2150 = vmatpush3.bf16.msra.mxu0 %v2493_v18 }
  0xd8   :  { %2151 = vmatprep.subr.bf16.mxu0 %v2422_v0 }
  0xdb   :  { %2153 = vmatpush3.bf16.msra.mxu0 %v2504_v32 }
  0xdc   :  { %2154 = vmatprep.subr.bf16.mxu0 %v2422_v0 }
  0xdf   :  { %2156 = vmatpush3.bf16.msra.mxu0 %v2520_v44 }
  0xe0   :  { %2157 = vmatprep.subr.bf16.mxu0 %v2422_v0 }
  0xe3   :  { %2159 = vmatpush3.bf16.msra.mxu0 %v2531_v49 }
  0xe4   :  { %2160 = vmatprep.subr.bf16.mxu0 %v2422_v0 }
  0xe7   :  { %2162 = vmatpush3.bf16.msra.mxu0 %v2533_v50 }
  0xe8   :  { %2163 = vmatprep.subr.bf16.mxu0 %v2422_v0 }
  0xeb   :  { %2165 = vmatpush3.bf16.msra.mxu0 %v2535_v51 }
  0xee   :  { %1810 = vmatmul.mubr.f32.vlgmr.msra.gmra.mrb[0].mxu0 %v2501_v31 }
 0x1c1   :  { %v700_v42 = vpop.f32.mrb[0].mxu0 }
 0x1c2   :  { %v704_v52 = vmul.f32 0.03125, %v700_v42  ;;  %v1811_v55 = vpop.f32.mrb[1].mxu0 }
 0x1c4   :  { %v2769_v59 = vsub.f32 %v2495_v22, %v704_v52 }
 0x1c6   :  { %v706_v61 = vmul.f32 %v2769_v59, %v2769_v59 }
 0x1c8   :  { %v2773_v62 = vand.u32 4294901760, %v706_v61 }
 0x1ca   :  { %v789_v63 = vsub.f32 %v706_v61, %v2773_v62 }
 0x1cc   :  { %v790_v2 = vand.u32 4294901760, %v789_v63 }
 0x1ce   :  { %v791_v3 = vsub.f32 %v789_v63, %v790_v2 }
 0x1d0   :  { %v792_v4 = vand.u32 4294901760, %v791_v3 }
 0x1d2   :  { %1845 = vmatmul.mubr.f32.vlgmr.msra.gmra.mrb[0].mxu1 %v792_v4 }
 0x1d3   :  { %2192 = vmatpush3.bf16.msra.mxu1 %v2611_v41  ;;  %1879 = vmatprep.mubr.msk.f32.mxu1 %vm2423_vm0, %v2424_v1 }
 0x1d4   :  { %2193 = vmatprep.subr.bf16.mxu1 %v2422_v0 }
 0x1d7   :  { %2195 = vmatpush3.bf16.msra.mxu1 %v2619_v57 }
 0x1d8   :  { %2196 = vmatprep.subr.bf16.mxu1 %v2422_v0 }
 0x1db   :  { %2198 = vmatpush3.bf16.msra.mxu1 %v2626_v8 }
 0x1dc   :  { %2199 = vmatprep.subr.bf16.mxu1 %v2422_v0 }
 0x1df   :  { %2201 = vmatpush3.bf16.msra.mxu1 %v2633_v16 }
 0x1e0   :  { %2202 = vmatprep.subr.bf16.mxu1 %v2422_v0 }
 0x1e3   :  { %2204 = vmatpush3.bf16.msra.mxu1 %v2639_v17 }
 0x1e4   :  { %2205 = vmatprep.subr.bf16.mxu1 %v2422_v0 }
 0x1e7   :  { %2207 = vmatpush3.bf16.msra.mxu1 %v2645_v58 }
 0x1e8   :  { %2208 = vmatprep.subr.bf16.mxu1 %v2422_v0 }
 0x1eb   :  { %2210 = vmatpush3.bf16.msra.mxu1 %v2650_v6 }
 0x1ec   :  { %2211 = vmatprep.subr.bf16.mxu1 %v2422_v0 }
 0x1ef   :  { %2213 = vmatpush3.bf16.msra.mxu1 %v2654_v25 }
 0x1f0   :  { %2214 = vmatprep.subr.bf16.mxu1 %v2422_v0 }
 0x1f2   :  { %1880 = vmatmul.mubr.f32.vlgmr.msra.gmra.mrb[0].mxu1 %v2773_v62 }
 0x1f3   :  { %2216 = vmatpush3.bf16.msra.mxu1 %v2660_v26  ;;  %1914 = vmatprep.mubr.msk.f32.mxu1 %vm2423_vm0, %v2424_v1 }
 0x1f4   :  { %2217 = vmatprep.subr.bf16.mxu1 %v2422_v0 }
 0x1f7   :  { %2219 = vmatpush3.bf16.msra.mxu1 %v2667_v10 }
 0x1f8   :  { %2220 = vmatprep.subr.bf16.mxu1 %v2422_v0 }
 0x1fb   :  { %2222 = vmatpush3.bf16.msra.mxu1 %v2675_v34 }
 0x1fc   :  { %2223 = vmatprep.subr.bf16.mxu1 %v2422_v0 }
 0x1ff   :  { %2225 = vmatpush3.bf16.msra.mxu1 %v2681_v35 }
 0x200   :  { %2226 = vmatprep.subr.bf16.mxu1 %v2422_v0 }
 0x203   :  { %2228 = vmatpush3.bf16.msra.mxu1 %v2687_v43 }
 0x204   :  { %2229 = vmatprep.subr.bf16.mxu1 %v2422_v0 }
 0x207   :  { %2231 = vmatpush3.bf16.msra.mxu1 %v2693_v47 }
 0x208   :  { %2232 = vmatprep.subr.bf16.mxu1 %v2422_v0 }
 0x20b   :  { %2234 = vmatpush3.bf16.msra.mxu1 %v2699_v48 }
 0x20c   :  { %2235 = vmatprep.subr.bf16.mxu1 %v2422_v0 }
 0x20f   :  { %2237 = vmatpush3.bf16.msra.mxu1 %v2705_v54 }
 0x210   :  { %2238 = vmatprep.subr.bf16.mxu1 %v2422_v0 }
 0x212   :  { %1915 = vmatmul.mubr.f32.vlgmr.msra.gmra.mrb[0].mxu1 %v789_v63 }
 0x213   :  { %2240 = vmatpush3.bf16.msra.mxu1 %v2484_v12  ;;  %1949 = vmatprep.mubr.msk.f32.mxu1 %vm2423_vm0, %v2424_v1 }
 0x214   :  { %2241 = vmatprep.subr.bf16.mxu1 %v2422_v0 }
 0x217   :  { %2243 = vmatpush3.bf16.msra.mxu1 %v2487_v13 }
 0x218   :  { %2244 = vmatprep.subr.bf16.mxu1 %v2422_v0 }
 0x21b   :  { %2246 = vmatpush3.bf16.msra.mxu1 %v2493_v18 }
 0x21c   :  { %2247 = vmatprep.subr.bf16.mxu1 %v2422_v0 }
 0x21f   :  { %2249 = vmatpush3.bf16.msra.mxu1 %v2504_v32 }
 0x220   :  { %2250 = vmatprep.subr.bf16.mxu1 %v2422_v0 }
 0x223   :  { %2252 = vmatpush3.bf16.msra.mxu1 %v2520_v44 }
 0x224   :  { %2253 = vmatprep.subr.bf16.mxu1 %v2422_v0 }
 0x227   :  { %2255 = vmatpush3.bf16.msra.mxu1 %v2531_v49 }
 0x228   :  { %2256 = vmatprep.subr.bf16.mxu1 %v2422_v0 }
 0x22b   :  { %2258 = vmatpush3.bf16.msra.mxu1 %v2533_v50 }
 0x22c   :  { %2259 = vmatprep.subr.bf16.mxu1 %v2422_v0 }
 0x22f   :  { %2261 = vmatpush3.bf16.msra.mxu1 %v2535_v51 }
 0x230   :  { %2262 = vmatprep.subr.bf16.mxu1 %v2422_v0 }
 0x232   :  { %1950 = vmatmul.mubr.f32.vlgmr.msra.gmra.mrb[0].mxu1 %v790_v2 }
 0x233   :  { %2264 = vmatpush3.bf16.msra.mxu1 %v2589_v27  ;;  %1984 = vmatprep.mubr.msk.f32.mxu1 %vm2423_vm0, %v2424_v1 }
 0x234   :  { %2265 = vmatprep.subr.bf16.mxu1 %v2422_v0 }
 0x237   :  { %2267 = vmatpush3.bf16.msra.mxu1 %v2591_v28 }
 0x238   :  { %2268 = vmatprep.subr.bf16.mxu1 %v2422_v0 }
 0x23b   :  { %2270 = vmatpush3.bf16.msra.mxu1 %v2593_v29 }
 0x23c   :  { %2271 = vmatprep.subr.bf16.mxu1 %v2422_v0 }
 0x23f   :  { %2273 = vmatpush3.bf16.msra.mxu1 %v2596_v30 }
 0x240   :  { %2274 = vmatprep.subr.bf16.mxu1 %v2422_v0 }
 0x243   :  { %2276 = vmatpush3.bf16.msra.mxu1 %v2598_v33 }
 0x244   :  { %2277 = vmatprep.subr.bf16.mxu1 %v2422_v0 }
 0x247   :  { %2279 = vmatpush3.bf16.msra.mxu1 %v2600_v36 }
 0x248   :  { %2280 = vmatprep.subr.bf16.mxu1 %v2422_v0 }
 0x24b   :  { %2282 = vmatpush3.bf16.msra.mxu1 %v2602_v37 }
 0x24c   :  { %2283 = vmatprep.subr.bf16.mxu1 %v2422_v0 }
 0x24f   :  { %2285 = vmatpush3.bf16.msra.mxu1 %v2605_v38 }
 0x250   :  { %2286 = vmatprep.subr.bf16.mxu1 %v2422_v0 }
 0x252   :  { %1985 = vmatmul.mubr.f32.vlgmr.msra.gmra.mrb[0].mxu1 %v2773_v62 }
 0x253   :  { %2288 = vmatpush3.bf16.msra.mxu1 %v2484_v12  ;;  %2019 = vmatprep.mubr.msk.f32.mxu1 %vm2423_vm0, %v2424_v1 }
 0x254   :  { %2289 = vmatprep.subr.bf16.mxu1 %v2422_v0 }
 0x257   :  { %2291 = vmatpush3.bf16.msra.mxu1 %v2487_v13 }
 0x258   :  { %2292 = vmatprep.subr.bf16.mxu1 %v2422_v0 }
 0x25b   :  { %2294 = vmatpush3.bf16.msra.mxu1 %v2493_v18 }
 0x25c   :  { %2295 = vmatprep.subr.bf16.mxu1 %v2422_v0 }
 0x25f   :  { %2297 = vmatpush3.bf16.msra.mxu1 %v2504_v32 }
 0x260   :  { %2298 = vmatprep.subr.bf16.mxu1 %v2422_v0 }
 0x263   :  { %2300 = vmatpush3.bf16.msra.mxu1 %v2520_v44 }
 0x264   :  { %2301 = vmatprep.subr.bf16.mxu1 %v2422_v0 }
 0x267   :  { %2303 = vmatpush3.bf16.msra.mxu1 %v2531_v49 }
 0x268   :  { %2304 = vmatprep.subr.bf16.mxu1 %v2422_v0 }
 0x26b   :  { %2306 = vmatpush3.bf16.msra.mxu1 %v2533_v50 }
 0x26c   :  { %2307 = vmatprep.subr.bf16.mxu1 %v2422_v0  ;;  %v1396_v0 = vld [vmem:[%s2891_s1] ss:$0 sm:$0xff] }
 0x26f   :  { %2309 = vmatpush3.bf16.msra.mxu1 %v2535_v51 }
 0x272   :  { %2020 = vmatmul.mubr.f32.vlgmr.msra.gmra.mrb[0].mxu1 %v2773_v62 }
 0x345   :  { %v1344_v1 = vpop.f32.mrb[0].mxu1 }
 0x346   :  { %v1348_v12 = vmul.f32 0.032258064, %v1344_v1  ;;  %v2021_v13 = vpop.f32.mrb[1].mxu1 }
 0x348   :  { %v1349_v18 = vmax.f32 %v1348_v12, 0.0 }
 0x34a   :  { %2340 = vrsqrt.f32 %v1349_v18  ;;  %vm1352_vm1 = vcmp.eq.f32.partialorder %v1349_v18, inf  ;;  %v1355_v32 = vand.u32 2147483648, %v1349_v18  ;;  %vm1354_vm2 = vcmp.eq.f32.partialorder %v1349_v18, 0.0 }
 0x354   :  { %v2341_v22 = vpop.eup %2340 }
 0x355   :  { %v1351_v31 = vmul.f32 %v2341_v22, %v1349_v18 }
 0x357   :  { %v1353_v44 = vsel %vm1352_vm1, %v1349_v18, %v1351_v31 }
 0x358   :  { %v1356_v49 = vsel %vm1354_vm2, %v1355_v32, %v1353_v44 }
 0x359   :  { %v1357_v5 = vadd.f32 1e-06, %v1356_v49 }
 0x35b   :  { %2342 = vrcp.f32 %v1357_v5 }
 0x365   :  { %v2343_v50 = vpop.eup %2342 }
 0x366   :  { %v1362_v51 = vmul.f32 %v2343_v50, %v2769_v59 }
 0x368   :  { %v1369_v27 = vmul.f32 %v1396_v0, %v1362_v51 }
 0x36a   :  { %v1376_v28 = vadd.f32 %v1397_v9, %v1369_v27 }
 0x36c   :  { %1377 = vst [vmem:[#allocation7] sm:$0xff] %v1376_v28 }
 0x36d   :  { %1382 = vsyncadd [#allocation4], 64  ;;  %s2425_s20 = smov [#allocation7]  }
 0x36e   :  { %s1383_s21 = sshll.u32 %s2425_s20, 4  ;;  %s1384_s21 = int_to_ptr.vmem [resolvable:$true] %s1383_s21 }
 0x36f   :  { %s2388_s22 = scalar_lea.vmem %s1384_s21, 64  ;;  %s2392_s23 = scalar_lea.vmem %s1384_s21, 128 }
 0x370   :  { %p2389_p2 = scmp.ne.s32.totalorder %s1384_s21, %s2388_s22  ;;  %p2393_p3 = scmp.lt.s32.totalorder %s1384_s21, %s1384_s21 }
 0x371   :  { %p2394_p4 = scmp.lt.s32.totalorder %s2392_s23, %s2388_s22 }
 0x373   :  { %p2395_p5 = por %p2394_p4, %p2393_p3 }
 0x375   :  { %p2396_p6 = pnand %p2395_p5, %p2389_p2 }
 0x377   :  { %2399 = shalt.err (!%p2396_p6)
}
 0x378   :  { %s2400_s25 = scalar_lea.hbm %s2894_s4, 64 }
 0x379   :  { %p2401_p7 = scmp.ne.s32.totalorder %s2894_s4, %s2400_s25  ;;  %p2404_p8 = scmp.lt.u32.totalorder %s2400_s25, %s2894_s4 }
 0x37b   :  { %p2406_p9 = pnand %p2404_p8, %p2401_p7 }
 0x37d   :  { %2409 = shalt.err (!%p2406_p9)
}
 0x37e   :  { %1389 = dma.vmem_to_hbm [thread:$0]  %s1384_s21, 64, %s2894_s4, [#allocation4], %s2417_s26, %s2417_s26, %s2418_s27  }
 0x37f   :  { %2414 = dma.done.wait [#allocation4], 128  }
 0x380   :  { %2415 = vsyncadd [#allocation4], 4294967168 }
 0x381   :  { %1393 = vsyncpa [#allocation3], 1 }
 0x382   :  { %1394 = vsyncpa [#allocation6], 1 }
 0x383   :  { %1395 = vsyncpa [#allocation4], 1 }

</bundles_post_ra>
